<compile_context>
chip_gen: v7x
topology: tpu7x:2x2x1
jax: 0.10.0
libtpu: 0.0.40
codegen_flags: <defaults>
</compile_context>

<pallas_src>
import functools

import jax
import jax.numpy as jnp
import numpy as np
from jax.experimental import pallas as pl
from jax.experimental.pallas import tpu as pltpu


# ----------------------------------------------------------------------------
# kernels
# ----------------------------------------------------------------------------
def _asci_kernel_masked(beta, s_valid, ragged_s,
                        inp_ref, tgt_ref, msk_ref, loss_ref, hits_acc, msum_acc):
    """Masked ASCI: streams (TM, TS) tiles along the signal axis (grid axis 1)."""
    k = pl.program_id(1)

    @pl.when(k == 0)
    def _init():
        hits_acc[...] = jnp.zeros_like(hits_acc)
        msum_acc[...] = jnp.zeros_like(msum_acc)

    inp = inp_ref[...].astype(jnp.float32)
    tgt = tgt_ref[...].astype(jnp.float32)
    msk = msk_ref[...].astype(jnp.float32)

    if ragged_s:
        # No wrapper-side padding: the last signal tile contains garbage columns.
        # Zero the mask there so they contribute nothing (static check: this code
        # is only compiled when the signal axis is actually ragged).
        col = k * inp.shape[-1] + jax.lax.broadcasted_iota(jnp.int32, inp.shape, 1)
        msk = jnp.where(col < s_valid, msk, 0.0)

    cond = jnp.abs(inp - tgt) <= beta * jnp.abs(tgt)
    hit = jnp.where(cond, msk, 0.0)  # mask-weighted agreement hits

    hits_acc[...] += jnp.sum(hit, axis=-1, keepdims=True)   # (TM, 1)
    msum_acc[...] += jnp.sum(msk, axis=-1, keepdims=True)   # (TM, 1)

    @pl.when(k == pl.num_programs(1) - 1)
    def _finalize():
        hits = hits_acc[...]
        msum = msum_acc[...]
        den = jnp.maximum(msum, 1.0)                         # avoid /0 on empty masks
        # sum(agree*mask) = 2*hits - msum  ->  loss = 1 - (2*hits - msum)/den
        loss_ref[...] = 1.0 - (2.0 * hits - msum) / den


def _asci_kernel_nomask(beta, s_valid, ragged_s,
                        inp_ref, tgt_ref, loss_ref, hits_acc):
    """mask=None specialization: no mask HBM stream; den is the constant sig_len."""
    k = pl.program_id(1)

    @pl.when(k == 0)
    def _init():
        hits_acc[...] = jnp.zeros_like(hits_acc)

    inp = inp_ref[...].astype(jnp.float32)
    tgt = tgt_ref[...].astype(jnp.float32)

    cond = jnp.abs(inp - tgt) <= beta * jnp.abs(tgt)
    if ragged_s:
        col = k * inp.shape[-1] + jax.lax.broadcasted_iota(jnp.int32, inp.shape, 1)
        cond = jnp.logical_and(cond, col < s_valid)
    hit = jnp.where(cond, 1.0, 0.0)

    hits_acc[...] += jnp.sum(hit, axis=-1, keepdims=True)    # (TM, 1)

    @pl.when(k == pl.num_programs(1) - 1)
    def _finalize():
        # loss = 1 - (2*hits - S)/S = 2*(1 - hits/S)
        loss_ref[...] = 2.0 * (1.0 - hits_acc[...] / float(s_valid))


# ----------------------------------------------------------------------------
# wrapper
# ----------------------------------------------------------------------------
def _round_up(x, m):
    return ((x + m - 1) // m) * m


def _vmem_capacity_bytes():
    """Physical VMEM of the local chip; conservative v7x fallback (64 MiB)."""
    try:
        info = pltpu.get_tpu_info()
        cap = getattr(info, "vmem_capacity_bytes", None)
        if cap:
            return int(cap)
    except Exception:
        pass
    return 64 * 1024 * 1024


def _pick_row_tile(R, max_tile_rows, min_row_tiles):
    """Row tile: multiple of 8 (or the full dim for tiny R), <= max_tile_rows,
    and — when R allows — small enough that the 'parallel' rows axis has at
    least `min_row_tiles` iterations so v7x's two TensorCores both get work."""
    if R <= 8:
        return R                                   # full-dim tile is always legal
    tm = min(max_tile_rows, (R // 8) * 8)          # largest multiple of 8 <= R
    if min_row_tiles > 1 and R >= 16:
        split = _round_up(pl.cdiv(R, min_row_tiles), 8)
        tm = min(tm, split)
    return max(tm, 8)


def asci_loss(inp, target, mask=None, beta=0.05, reduction="mean",
              *, max_tile_rows=512, max_tile_lanes=2048, min_row_tiles=2):
    """ASCI loss. inp/target/mask: (batch, num_leads, sig_len)."""
    B, L, S = target.shape
    if inp.shape[-1] != S:
        # glue: linear resampling of the prediction to the target length.
        # TODO(synk): fuse this lerp into the kernel to drop the HBM round trip.
        inp = jax.image.resize(inp, (B, L, S), method="linear")

    R = B * L
    inp2 = inp.reshape(R, S)
    tgt2 = target.reshape(R, S)

    streams = [inp2, tgt2]
    msk2 = None
    if mask is not None:
        msk2 = mask.reshape(R, S)
        if msk2.dtype == jnp.bool_:
            # 1-byte stream through HBM; upcast to f32 in VMEM.
            msk2 = msk2.astype(jnp.int8)
        streams.append(msk2)

    # ---- VMEM budget / tile selection --------------------------------------
    vmem_cap = _vmem_capacity_bytes()                 # 64 MiB v7x, 128 MiB v5e/v6e
    vmem_limit = int(min((vmem_cap * 3) // 4, 96 * 1024 * 1024))

    TM = _pick_row_tile(R, max_tile_rows, min_row_tiles)

    # Signal tile: full S if it fits (always a legal block), else a multiple of
    # 128 capped so double-buffered HBM-dtype streams + f32 temps fit in ~half
    # of the scoped-VMEM budget.
    bytes_per_col = sum(a.dtype.itemsize for a in streams)
    per_lane_bytes = TM * (2 * bytes_per_col + 3 * 4)     # 2 bufs/stream + f32 temps
    lane_budget = max(128, (vmem_limit // 2) // max(per_lane_bytes, 1))
    ts_cap = max(128, min(max_tile_lanes, (lane_budget // 128) * 128))
    TS = S if S <= ts_cap else ts_cap
    ragged_s = (S % TS) != 0

    grid = (pl.cdiv(R, TM), pl.cdiv(S, TS))
    io_spec = lambda: pl.BlockSpec((TM, TS), lambda i, k: (i, k))
    out_spec = pl.BlockSpec((TM, 1), lambda i, k: (i, 0))   # resident across k
    out_shape = jax.ShapeDtypeStruct((R, 1), jnp.float32)
    compiler_params = pltpu.CompilerParams(
        dimension_semantics=("parallel", "arbitrary"),      # rows shard across TCs
        vmem_limit_bytes=vmem_limit,
    )

    if mask is None:
        kernel = functools.partial(_asci_kernel_nomask, float(beta), S, ragged_s)
        bytes_accessed = R * S * (inp2.dtype.itemsize + tgt2.dtype.itemsize) + R * 4
        per_row = pl.pallas_call(
            kernel,
            out_shape=out_shape,
            grid_spec=pltpu.PrefetchScalarGridSpec(
                num_scalar_prefetch=0,
                grid=grid,
                in_specs=[io_spec(), io_spec()],
                out_specs=out_spec,
                scratch_shapes=[pltpu.VMEM((TM, 1), jnp.float32)],
            ),
            compiler_params=compiler_params,
            cost_estimate=pl.CostEstimate(
                flops=8 * R * S, transcendentals=0, bytes_accessed=bytes_accessed),
        )(inp2, tgt2)
    else:
        kernel = functools.partial(_asci_kernel_masked, float(beta), S, ragged_s)
        bytes_accessed = (R * S * (inp2.dtype.itemsize + tgt2.dtype.itemsize
                                   + msk2.dtype.itemsize) + R * 4)
        per_row = pl.pallas_call(
            kernel,
            out_shape=out_shape,
            grid_spec=pltpu.PrefetchScalarGridSpec(
                num_scalar_prefetch=0,
                grid=grid,
                in_specs=[io_spec(), io_spec(), io_spec()],
                out_specs=out_spec,
                scratch_shapes=[pltpu.VMEM((TM, 1), jnp.float32),
                                pltpu.VMEM((TM, 1), jnp.float32)],
            ),
            compiler_params=compiler_params,
            cost_estimate=pl.CostEstimate(
                flops=10 * R * S, transcendentals=0, bytes_accessed=bytes_accessed),
        )(inp2, tgt2, msk2)

    per_lead = per_row[:R, 0].reshape(B, L)
    if reduction == "mean":
        return jnp.mean(per_lead)
    if reduction == "sum":
        return jnp.sum(per_lead)
    return per_lead


# ----------------------------------------------------------------------------
# pure-JAX reference (for correctness checking)
# ----------------------------------------------------------------------------
def _asci_loss_ref(inp, target, mask, beta, reduction):
    B, L, S = target.shape
    if inp.shape[-1] != S:
        inp = jax.image.resize(inp, (B, L, S), method="linear")
    if mask is None:
        mask = jnp.ones_like(target)
    mask = mask.astype(jnp.float32)
    agree = jnp.where(jnp.abs(inp - target) <= beta * jnp.abs(target), 1.0, -1.0)
    asci = jnp.sum(agree * mask, axis=-1) / jnp.maximum(jnp.sum(mask, axis=-1), 1.0)
    loss = 1.0 - asci
    if reduction == "mean":
        return jnp.mean(loss)
    if reduction == "sum":
        return jnp.sum(loss)
    return loss


if __name__ == "__main__":
    key = jax.random.PRNGKey(0)
    k1, k2 = jax.random.split(key, 2)

    # ECG-like small shapes: 12 leads, prediction at half the target length,
    # target length deliberately NOT a multiple of 128 (ragged tiling) and
    # B*L = 48 rows (forces the >=2 row-tile split).
    B, LEADS, S_TGT, S_INP = 4, 12, 200, 100
    beta = 0.05

    target = jax.random.normal(k1, (B, LEADS, S_TGT), dtype=jnp.float32)
    inp = target[..., ::2] + 0.02 * jax.random.normal(k2, (B, LEADS, S_INP), dtype=jnp.float32)

    # mask out the tail of the last two batch elements + one whole lead
    mask = jnp.ones((B, LEADS, S_TGT), dtype=jnp.float32)
    mask = mask.at[2:, :, 160:].set(0.0)
    mask = mask.at[3, 5, :].set(0.0)

    # 1) masked, mean, default tiling (single signal tile, 2 row tiles)
    loss = jax.block_until_ready(asci_loss(inp, target, mask=mask, beta=beta, reduction="mean"))
    np.testing.assert_allclose(np.asarray(loss),
                               np.asarray(_asci_loss_ref(inp, target, mask, beta, "mean")),
                               rtol=1e-5, atol=1e-5)

    # 2) masked, none, forced multi-tile grid along the signal axis
    #    (TS=128 -> ragged last tile exercises the in-kernel column-validity mask)
    per_lead = jax.block_until_ready(
        asci_loss(inp, target, mask=mask, beta=beta, reduction="none",
                  max_tile_rows=32, max_tile_lanes=128))
    np.testing.assert_allclose(np.asarray(per_lead),
                               np.asarray(_asci_loss_ref(inp, target, mask, beta, "none")),
                               rtol=1e-5, atol=1e-5)

    # 3) maskless specialization, sum, multi signal tiles (iota tail mask, no mask stream)
    loss_nm = jax.block_until_ready(
        asci_loss(inp, target, mask=None, beta=beta, reduction="sum", max_tile_lanes=128))
    np.testing.assert_allclose(np.asarray(loss_nm),
                               np.asarray(_asci_loss_ref(inp, target, None, beta, "sum")),
                               rtol=1e-5, atol=1e-5)

    # 4) maskless, none, default tiling
    per_lead_nm = jax.block_until_ready(asci_loss(inp, target, mask=None, beta=beta, reduction="none"))
    np.testing.assert_allclose(np.asarray(per_lead_nm),
                               np.asarray(_asci_loss_ref(inp, target, None, beta, "none")),
                               rtol=1e-5, atol=1e-5)

    # 5) bool mask path (shipped as int8 through HBM, upcast in VMEM)
    per_lead_b = jax.block_until_ready(
        asci_loss(inp, target, mask=(mask > 0), beta=beta, reduction="none"))
    np.testing.assert_allclose(np.asarray(per_lead_b),
                               np.asarray(_asci_loss_ref(inp, target, mask, beta, "none")),
                               rtol=1e-5, atol=1e-5)

    print("KERNEL_OK")
</pallas_src>

<mosaic_0001>
module attributes {stable_mosaic.version = 11 : i64} {
  func.func @_asci_kernel_masked(%arg0: i32, %arg1: i32, %arg2: memref<24x200xf32, #tpu.memory_space<vmem>>, %arg3: memref<24x200xf32, #tpu.memory_space<vmem>>, %arg4: memref<24x200xf32, #tpu.memory_space<vmem>>, %arg5: memref<24x1xf32, #tpu.memory_space<vmem>>, %arg6: memref<24x1xf32, #tpu.memory_space<vmem>>, %arg7: memref<24x1xf32, #tpu.memory_space<vmem>>) attributes {dimension_semantics = [#tpu.dimension_semantics<parallel>, #tpu.dimension_semantics<arbitrary>], iteration_bounds = array<i64: 2, 1>, scalar_prefetch = 0 : i64, scratch_operands = 2 : i64, tpu.core_type = #tpu.core_type<tc>, window_params = [{transform_indices = @transform_0, window_bounds = array<i64: 24, 200>}, {transform_indices = @transform_1, window_bounds = array<i64: 24, 200>}, {transform_indices = @transform_2, window_bounds = array<i64: 24, 200>}, {transform_indices = @transform_3, window_bounds = array<i64: 24, 1>}]} {
    %c0_i32 = arith.constant 0 : i32
    %0 = arith.cmpi eq, %arg1, %c0_i32 : i32
    %1 = arith.extui %0 : i1 to i32
    %c0_i32_0 = arith.constant 0 : i32
    %2 = arith.cmpi ne, %1, %c0_i32_0 : i32
    scf.if %2 {
      %cst_19 = arith.constant 0.000000e+00 : f32
      %27 = vector.broadcast %cst_19 : f32 to vector<24x1xf32>
      %c0_20 = arith.constant 0 : index
      %c0_21 = arith.constant 0 : index
      %28 = vector.load %arg6[%c0_20, %c0_21] : memref<24x1xf32, #tpu.memory_space<vmem>>, vector<24x1xf32>
      tpu.vector_store %arg6[%c0_20, %c0_21], %27 {strides = array<i32>} : memref<24x1xf32, #tpu.memory_space<vmem>>, vector<24x1xf32>,
      %cst_22 = arith.constant 0.000000e+00 : f32
      %29 = vector.broadcast %cst_22 : f32 to vector<24x1xf32>
      %c0_23 = arith.constant 0 : index
      %c0_24 = arith.constant 0 : index
      %30 = vector.load %arg7[%c0_23, %c0_24] : memref<24x1xf32, #tpu.memory_space<vmem>>, vector<24x1xf32>
      tpu.vector_store %arg7[%c0_23, %c0_24], %29 {strides = array<i32>} : memref<24x1xf32, #tpu.memory_space<vmem>>, vector<24x1xf32>,
    } else {
    }
    %c0 = arith.constant 0 : index
    %c0_1 = arith.constant 0 : index
    %3 = vector.load %arg2[%c0, %c0_1] : memref<24x200xf32, #tpu.memory_space<vmem>>, vector<24x200xf32>
    %c0_2 = arith.constant 0 : index
    %c0_3 = arith.constant 0 : index
    %4 = vector.load %arg3[%c0_2, %c0_3] : memref<24x200xf32, #tpu.memory_space<vmem>>, vector<24x200xf32>
    %c0_4 = arith.constant 0 : index
    %c0_5 = arith.constant 0 : index
    %5 = vector.load %arg4[%c0_4, %c0_5] : memref<24x200xf32, #tpu.memory_space<vmem>>, vector<24x200xf32>
    %6 = arith.subf %3, %4 : vector<24x200xf32>
    %7 = math.absf %6 : vector<24x200xf32>
    %8 = math.absf %4 : vector<24x200xf32>
    %cst = arith.constant 5.000000e-02 : f32
    %9 = vector.broadcast %cst : f32 to vector<24x200xf32>
    %10 = arith.mulf %9, %8 : vector<24x200xf32>
    %11 = arith.cmpf ole, %7, %10 : vector<24x200xf32>
    %cst_6 = arith.constant 0.000000e+00 : f32
    %12 = vector.broadcast %cst_6 : f32 to vector<24x200xf32>
    %13 = arith.select %11, %5, %12 : vector<24x200xi1>, vector<24x200xf32>
    %c0_7 = arith.constant 0 : index
    %c0_8 = arith.constant 0 : index
    %14 = vector.load %arg6[%c0_7, %c0_8] : memref<24x1xf32, #tpu.memory_space<vmem>>, vector<24x1xf32>
    %cst_9 = arith.constant dense<0.000000e+00> : vector<24xf32>
    %15 = vector.multi_reduction <add>, %13, %cst_9 [1] : vector<24x200xf32> to vector<24xf32>
    %16 = vector.shape_cast %15 : vector<24xf32> to vector<24x1xf32>
    %17 = arith.addf %14, %16 : vector<24x1xf32>
    %c0_10 = arith.constant 0 : index
    %c0_11 = arith.constant 0 : index
    %18 = vector.load %arg6[%c0_10, %c0_11] : memref<24x1xf32, #tpu.memory_space<vmem>>, vector<24x1xf32>
    tpu.vector_store %arg6[%c0_10, %c0_11], %17 {strides = array<i32>} : memref<24x1xf32, #tpu.memory_space<vmem>>, vector<24x1xf32>,
    %c0_12 = arith.constant 0 : index
    %c0_13 = arith.constant 0 : index
    %19 = vector.load %arg7[%c0_12, %c0_13] : memref<24x1xf32, #tpu.memory_space<vmem>>, vector<24x1xf32>
    %cst_14 = arith.constant dense<0.000000e+00> : vector<24xf32>
    %20 = vector.multi_reduction <add>, %5, %cst_14 [1] : vector<24x200xf32> to vector<24xf32>
    %21 = vector.shape_cast %20 : vector<24xf32> to vector<24x1xf32>
    %22 = arith.addf %19, %21 : vector<24x1xf32>
    %c0_15 = arith.constant 0 : index
    %c0_16 = arith.constant 0 : index
    %23 = vector.load %arg7[%c0_15, %c0_16] : memref<24x1xf32, #tpu.memory_space<vmem>>, vector<24x1xf32>
    tpu.vector_store %arg7[%c0_15, %c0_16], %22 {strides = array<i32>} : memref<24x1xf32, #tpu.memory_space<vmem>>, vector<24x1xf32>,
    %c0_i32_17 = arith.constant 0 : i32
    %24 = arith.cmpi eq, %arg1, %c0_i32_17 : i32
    %25 = arith.extui %24 : i1 to i32
    %c0_i32_18 = arith.constant 0 : i32
    %26 = arith.cmpi ne, %25, %c0_i32_18 : i32
    scf.if %26 {
      %c0_19 = arith.constant 0 : index
      %c0_20 = arith.constant 0 : index
      %27 = vector.load %arg6[%c0_19, %c0_20] : memref<24x1xf32, #tpu.memory_space<vmem>>, vector<24x1xf32>
      %c0_21 = arith.constant 0 : index
      %c0_22 = arith.constant 0 : index
      %28 = vector.load %arg7[%c0_21, %c0_22] : memref<24x1xf32, #tpu.memory_space<vmem>>, vector<24x1xf32>
      %cst_23 = arith.constant 1.000000e+00 : f32
      %29 = vector.broadcast %cst_23 : f32 to vector<24x1xf32>
      %30 = arith.maximumf %28, %29 : vector<24x1xf32>
      %cst_24 = arith.constant 2.000000e+00 : f32
      %31 = vector.broadcast %cst_24 : f32 to vector<24x1xf32>
      %32 = arith.mulf %31, %27 : vector<24x1xf32>
      %33 = arith.subf %32, %28 : vector<24x1xf32>
      %34 = arith.divf %33, %30 : vector<24x1xf32>
      %cst_25 = arith.constant 1.000000e+00 : f32
      %35 = vector.broadcast %cst_25 : f32 to vector<24x1xf32>
      %36 = arith.subf %35, %34 : vector<24x1xf32>
      %c0_26 = arith.constant 0 : index
      %c0_27 = arith.constant 0 : index
      %37 = vector.load %arg5[%c0_26, %c0_27] : memref<24x1xf32, #tpu.memory_space<vmem>>, vector<24x1xf32>
      tpu.vector_store %arg5[%c0_26, %c0_27], %36 {strides = array<i32>} : memref<24x1xf32, #tpu.memory_space<vmem>>, vector<24x1xf32>,
    } else {
    }
    return
  }
  func.func @transform_0(%arg0: i32, %arg1: i32) -> (i32, i32) {
    %c0_i32 = arith.constant 0 : i32
    return %arg0, %arg1 : i32, i32
  }
  func.func @transform_1(%arg0: i32, %arg1: i32) -> (i32, i32) {
    %c0_i32 = arith.constant 0 : i32
    return %arg0, %arg1 : i32, i32
  }
  func.func @transform_2(%arg0: i32, %arg1: i32) -> (i32, i32) {
    %c0_i32 = arith.constant 0 : i32
    return %arg0, %arg1 : i32, i32
  }
  func.func @transform_3(%arg0: i32, %arg1: i32) -> (i32, i32) {
    %c0_i32 = arith.constant 0 : i32
    %c0_i32_0 = arith.constant 0 : i32
    return %arg0, %c0_i32 : i32, i32
  }
}

</mosaic_0001>

<bundles_post_ra>
// kernel: tpu_custom_call.1
= control target key start
LH: loop header
LB: loop body
LE: loop exit
PB: predicated region body
PF: predicated region fallthrough
CT: control target
= control target key end

     0   :  { %8 = vsyncpa [#allocation5], 0  ;;  %s1098_s0 = inlined_call_operand.hbm [shape: f32[48,200], index: 0, kind: input, shape index: {}]   ;;  %s1099_s1 = inlined_call_operand.hbm [shape: f32[48,200], index: 1, kind: input, shape index: {}]   ;;  %s1100_s2 = inlined_call_operand.hbm [shape: f32[48,200], index: 2, kind: input, shape index: {}]   ;;  %s1101_s3 = inlined_call_operand.vmem [shape: f32[48,1], index: 3, kind: output, shape index: {}]  }
   0x1   :  { %10 = vsyncpa [#allocation5 + $0x1], 0 }
   0x2   :  { %11 = vsyncpa [#allocation7], 0 }
   0x3   :  { %13 = vsyncpa [#allocation7 + $0x1], 0  ;;  %s842_s12 = smov 0   ;;  %s844_s13 = smov 0  }
   0x4   :  { %s846_s14 = smov 0   ;;  %s848_s15 = smov 0  }
   0x5   :  { %s850_s16 = smov 0   ;;  %s852_s17 = smov 0  }
   0x6 LB: > { %s1103_s18 = sadd.s32 4294967295, %s814_s17   ;;  %s31_s19 = sadd.s32 1, %s810_s16  ;;  %s814_s17 = sphi %s852_s17, %s19_s17   ;;  %s810_s16 = sphi %s850_s16, %s1116_s16   ;;  %s806_s15 = sphi %s848_s15, %s1115_s15   ;;  %s802_s14 = sphi %s846_s14, %s1114_s14   ;;  %s798_s13 = sphi %s844_s13, %s1113_s13   ;;  %s794_s12 = sphi %s842_s12, %s1112_s12  }
   0x7   : > { %p33_p0 = scmp.ge.s32.totalorder %s31_s19, 2  ;;  %s40_s20 = sadd.s32 1, %s802_s14 }
   0x8   : > { %p47_p1 = scmp.ne.s32.totalorder %s802_s14, %s798_s13  ;;  %p48_p2 = scmp.eq.s32.totalorder %s814_s17, 0 }
   0x9   : > { %s1118_s19 = smov (%p33_p0, %s31_s19), 0  ;;  %p53_p4 = scmp.ne.s32.totalorder %s798_s13, %s794_s12 }
   0xa   : > { %p49_p3 = por %p48_p2, %p47_p1  ;;  %s35_s21 = ssub.s32 %s810_s16, %s1118_s19 }
   0xb   : > { %p54_p5 = scmp.eq.s32.totalorder %s1103_s18, 0  ;;  %p38_p6 = scmp.eq.s32.totalorder %s35_s21, 0 }
   0xc   : > { %p612_p8 = scmp.lt.s32.totalorder %s814_s17, 2  ;;  %s159_s24 = sand.u32 1, %s802_s14  }
   0xd   : > { %p883_p7 = por %p54_p5, %p53_p4  ;;  %s893_s25 = smul.u32 768, %s810_s16 }
   0xe   : > { %s889_s23 = scalar_select %p38_p6, %s802_s14, %s40_s20  }
   0xf   : > { %s1104_s22 = scalar_select %p883_p7, 1, 0 }
  0x10   : > { %s897_s26 = smul.u32 48, %s159_s24  ;;  %p899_p9 = pnand %p612_p8, %p49_p3 }
  0x11   : > { %s183_s28 = sand.u32 1, %s814_s17   ;;  %s908_s4 = scalar_lea.hbm %s1099_s1, %s893_s25 }
  0x12   : > { %s187_s5 = scalar_lea.vmem [#allocation6], %s897_s26  ;;  %s914_s7 = scalar_lea.sflag [#allocation7], %s183_s28 }
  0x13   : > { %s197_s6 = sshll.u32 %s187_s5, 4  ;;  %s670_s8 = scalar_lea.hbm %s908_s4, 768  ;;  %s911_s6 = int_to_ptr.vmem [resolvable:$true] %s197_s6 }
  0x14   : > { %p671_p11 = scmp.ne.s32.totalorder %s908_s4, %s670_s8  ;;  %p920_p12 = pneg %p899_p9 }
  0x15   : > { %s675_s12 = scalar_lea.hbm %s1099_s1, 1536  ;;  %p676_p1 = scmp.lt.u32.totalorder %s908_s4, %s1099_s1 }
  0x16   : > { %p673_p13 = pnand %p920_p12, %p671_p11  ;;  %p677_p2 = scmp.lt.u32.totalorder %s675_s12, %s670_s8 }
  0x17   : > { %p679_p4 = scmp.lt.u32.totalorder %s670_s8, %s908_s4 }
  0x18   : > { %p674_p0 = pneg %p673_p13  ;;  %p678_p3 = por %p677_p2, %p676_p1 }
  0x1a   : > { %p680_p5 = por %p679_p4, %p678_p3 }
  0x1c   : > { %p681_p6 = pnand %p680_p5, %p674_p0 }
  0x1e   : > { %684 = shalt.err (!%p681_p6)
}
  0x1f   : > { %s685_s28 = scalar_lea.vmem %s911_s6, 768  ;;  %s816_s29 = smov [#allocation6]  }
  0x20   : > { %p686_p8 = scmp.ne.s32.totalorder %s911_s6, %s685_s28  ;;  %s690_s30 = sshll.u32 %s816_s29, 4  ;;  %s691_s30 = int_to_ptr.vmem [resolvable:$false] %s690_s30 }
  0x21   : > { %s692_s5 = scalar_lea.vmem %s691_s30, 1536  ;;  %p693_p10 = scmp.lt.s32.totalorder %s911_s6, %s691_s30 }
  0x22   : > { %p688_p11 = pnand %p686_p8, %p920_p12  ;;  %p694_p7 = scmp.lt.s32.totalorder %s692_s5, %s685_s28 }
  0x24   : > { %p689_p13 = pneg %p688_p11  ;;  %p695_p1 = por %p694_p7, %p693_p10 }
  0x26   : > { %p696_p2 = pnand %p695_p1, %p689_p13 }
  0x28   : > { %699 = shalt.err (!%p696_p2)
}
  0x29   : > { %s817_s8 = smov 256   ;;  %s818_s10 = smov 16  }
  0x2a   : > { %608 = dma.hbm_to_vmem [thread:$0]  (!%p899_p9), %s908_s4, 768, %s911_s6, %s914_s7, %s817_s8, %s817_s8, %s818_s10  }
  0x2b   : > { %p229_p7 = scmp.lt.s32.totalorder %s814_s17, 3  ;;  %p1107_p10 = scmp.ge.s32.totalorder %s814_s17, 1 }
  0x2c   : > { %s958_s21 = scalar_lea.hbm %s1098_s0, %s893_s25  ;;  %s163_s28 = scalar_lea.vmem [#allocation4], %s897_s26 }
  0x2d   : > { %p950_p0 = pnand %p1107_p10, %p229_p7  ;;  %s173_s29 = sshll.u32 %s163_s28, 4  ;;  %s961_s29 = int_to_ptr.vmem [resolvable:$true] %s173_s29 }
  0x2e   : > { %s965_s4 = scalar_lea.sflag [#allocation5], %s159_s24  ;;  %s700_s6 = scalar_lea.hbm %s958_s21, 768 }
  0x2f   : > { %s1108_s11 = scalar_select %p950_p0, 1, 0 }
  0x30   : > { %p701_p3 = scmp.ne.s32.totalorder %s958_s21, %s700_s6  ;;  %s705_s12 = scalar_lea.hbm %s1098_s0, 1536 }
  0x31   : > { %p706_p6 = scmp.lt.u32.totalorder %s958_s21, %s1098_s0  ;;  %p707_p8 = scmp.lt.u32.totalorder %s705_s12, %s700_s6 }
  0x32   : > { %p703_p4 = pnand %p701_p3, %p920_p12  ;;  %p709_p13 = scmp.lt.u32.totalorder %s700_s6, %s958_s21 }
  0x33   : > { %p708_p11 = por %p707_p8, %p706_p6 }
  0x34   : > { %p704_p5 = pneg %p703_p4 }
  0x35   : > { %p710_p1 = por %p709_p13, %p708_p11 }
  0x37   : > { %p711_p2 = pnand %p710_p1, %p704_p5 }
  0x39   : > { %714 = shalt.err (!%p711_p2)
}
  0x3a   : > { %s715_s24 = scalar_lea.vmem %s961_s29, 768  ;;  %s819_s28 = smov [#allocation4]  }
  0x3b   : > { %p716_p7 = scmp.ne.s32.totalorder %s961_s29, %s715_s24  ;;  %s720_s30 = sshll.u32 %s819_s28, 4  ;;  %s721_s30 = int_to_ptr.vmem [resolvable:$false] %s720_s30 }
  0x3c   : > { %s722_s18 = scalar_lea.vmem %s721_s30, 1536  ;;  %p723_p4 = scmp.lt.s32.totalorder %s961_s29, %s721_s30 }
  0x3d   : > { %p718_p10 = pnand %p716_p7, %p920_p12  ;;  %p724_p0 = scmp.lt.s32.totalorder %s722_s18, %s715_s24 }
  0x3f   : > { %p719_p3 = pneg %p718_p10  ;;  %p725_p6 = por %p724_p0, %p723_p4 }
  0x41   : > { %p726_p8 = pnand %p725_p6, %p719_p3 }
  0x43   : > { %729 = shalt.err (!%p726_p8)
}
  0x44   : > { %605 = dma.hbm_to_vmem [thread:$0]  (!%p899_p9), %s958_s21, 768, %s961_s29, %s965_s4, %s817_s8, %s817_s8, %s818_s10  }
  0x45   : > { %s996_s12 = scalar_lea.hbm %s1100_s2, %s893_s25  ;;  %s211_s20 = scalar_lea.vmem [#allocation8], %s897_s26 }
  0x46   : > { %s221_s24 = sshll.u32 %s211_s20, 4  ;;  %s730_s28 = scalar_lea.hbm %s996_s12, 768  ;;  %s999_s24 = int_to_ptr.vmem [resolvable:$true] %s221_s24 }
  0x47   : > { %p731_p0 = scmp.ne.s32.totalorder %s996_s12, %s730_s28  ;;  %s735_s29 = scalar_lea.hbm %s1100_s2, 1536 }
  0x48   : > { %p736_p13 = scmp.lt.u32.totalorder %s996_s12, %s1100_s2  ;;  %p737_p1 = scmp.lt.u32.totalorder %s735_s29, %s730_s28 }
  0x49   : > { %p733_p5 = pnand %p731_p0, %p920_p12  ;;  %p739_p7 = scmp.lt.u32.totalorder %s730_s28, %s996_s12 }
  0x4a   : > { %p738_p2 = por %p737_p1, %p736_p13 }
  0x4b   : > { %p734_p11 = pneg %p733_p5 }
  0x4c   : > { %p740_p10 = por %p739_p7, %p738_p2 }
  0x4e   : > { %p741_p3 = pnand %p740_p10, %p734_p11 }
  0x50   : > { %744 = shalt.err (!%p741_p3)
}
  0x51   : > { %s745_s26 = scalar_lea.vmem %s999_s24, 768  ;;  %s820_s18 = smov [#allocation8]  }
  0x52   : > { %p746_p4 = scmp.ne.s32.totalorder %s999_s24, %s745_s26  ;;  %s750_s6 = sshll.u32 %s820_s18, 4  ;;  %s751_s6 = int_to_ptr.vmem [resolvable:$false] %s750_s6 }
  0x53   : > { %s752_s5 = scalar_lea.vmem %s751_s6, 1536  ;;  %p753_p0 = scmp.lt.s32.totalorder %s999_s24, %s751_s6 }
  0x54   : > { %p748_p6 = pnand %p746_p4, %p920_p12  ;;  %p754_p5 = scmp.lt.s32.totalorder %s752_s5, %s745_s26 }
  0x56   : > { %p749_p8 = pneg %p748_p6  ;;  %p755_p13 = por %p754_p5, %p753_p0 }
  0x58   : > { %p756_p1 = pnand %p755_p13, %p749_p8 }
  0x5a   : > { %759 = shalt.err (!%p756_p1)
}
  0x5b   : > { %611 = dma.hbm_to_vmem [thread:$0]  (!%p899_p9), %s996_s12, 768, %s999_s24, %s914_s7, %s817_s8, %s817_s8, %s818_s10  }
  0x5c   : > { %p1109_p12 = scmp.ne.s32.totalorder %s1108_s11, 0 }
  0x5d   : > { %s235_s9 = sand.u32 (!%p1109_p12), 1, %s798_s13   ;;  %p1110_p11 = scmp.ne.s32.totalorder (!%p1109_p12), %s1104_s22, 0 }
  0x5e   : > { %233 = sbr.rel (%p1109_p12) target bundleno = 288 (0x120), region = 32  ;;  %s236_s28 = scalar_lea.sflag (!%p1109_p12), [#allocation5], %s235_s9 }
  0x5f   : > { %s595_s20 = smul.u32 (!%p1109_p12), 48, %s235_s9 }
  0x61   : > { %s1029_s30 = scalar_lea.vmem (!%p1109_p12), [#allocation4], %s595_s20 }
  0x65   : > { %785 = dma.done.wait (%p1110_p11), %s236_s28, 768  }
  0x66   : > { %787 = vsyncadd (%p1110_p11), %s236_s28, 4294966528  ;;  %s1111_s27 = sadd.s32 4294967295, %s814_s17   ;;  %s1037_s8 = scalar_lea.vmem [#allocation6], %s595_s20 }
  0x67   : > { %s244_s21 = sand.u32 1, %s1111_s27  }
  0x68   : > { %s245_s7 = scalar_lea.sflag [#allocation7], %s244_s21 }
  0x69   : > { %789 = dma.done.wait (%p1110_p11), %s245_s7, 1536  }
  0x6a   : > { %791 = vsyncadd (%p1110_p11), %s245_s7, 4294965760  ;;  %vm306_vm0 = vcmask 7168   ;;  %v821_v0 = vmov 0.0   ;;  %vm370_vm1 = vcmask 588800   ;;  %s257_s22 = scalar_lea.vmem [#allocation8], %s595_s20  ;;  %v313_v3 = vld [vmem:[%s1029_s30] sm:$0xff] }
  0x6b   : > { %310 = vst.msk [vmem:[#allocation3] sm:$0xff] %vm306_vm0, %v821_v0  ;;  %307 = vst.msk [vmem:[#allocation2] sm:$0xff] %vm306_vm0, %v821_v0  ;;  %v325_v1 = vld [vmem:[%s257_s22] sm:$0xff]  ;;  %v326_v2 = vld [vmem:[%s257_s22 + $0x8] sm:$0xff]  ;;  %s296_s10 = smul.u32 3, %s806_s15 }
  0x6c   : > { %308 = vst.msk [vmem:[#allocation2 + $0x8] sm:$0xff] %vm306_vm0, %v821_v0  ;;  %309 = vst.msk [vmem:[#allocation2 + $0x10] sm:$0xff] %vm306_vm0, %v821_v0  ;;  %v393_v4 = vsel %vm370_vm1, %v326_v2, 0.0  ;;  %v314_v5 = vld [vmem:[%s1029_s30 + $0x8] sm:$0xff]  ;;  %v319_v6 = vld [vmem:[%s1037_s8] sm:$0xff] }
  0x6d   : > { %311 = vst.msk [vmem:[#allocation3 + $0x8] sm:$0xff] %vm306_vm0, %v821_v0  ;;  %312 = vst.msk [vmem:[#allocation3 + $0x10] sm:$0xff] %vm306_vm0, %v821_v0  ;;  %v320_v7 = vld [vmem:[%s1037_s8 + $0x8] sm:$0xff]  ;;  %v394_v8 = vadd.f32 %v393_v4, %v325_v1  ;;  %v331_v9 = vsub.f32 %v313_v3, %v319_v6  ;;  %v343_v11 = vand.u32 2147483647, %v319_v6  ;;  %v329_v12 = vld [vmem:[%s257_s22 + $0x20] sm:$0xff] }
  0x6e   : > { %v332_v10 = vsub.f32 %v314_v5, %v320_v7  ;;  %v330_v13 = vld [vmem:[%s257_s22 + $0x28] sm:$0xff]  ;;  %v317_v14 = vld [vmem:[%s1029_s30 + $0x20] sm:$0xff]  ;;  %v344_v15 = vand.u32 2147483647, %v320_v7  ;;  %v327_v28 = vld [vmem:[%s257_s22 + $0x10] sm:$0xff]  ;;  %p297_p9 = scmp.lt.s32.totalorder %s296_s10, 5 }
  0x6f   : > { %v401_v16 = vsel %vm370_vm1, %v330_v13, 0.0  ;;  %v318_v17 = vld [vmem:[%s1029_s30 + $0x28] sm:$0xff]  ;;  %v323_v18 = vld [vmem:[%s1037_s8 + $0x20] sm:$0xff]  ;;  %395 = vadd.xlane.f32.xlu0 %v394_v8  ;;  %v337_v20 = vand.u32 2147483647, %v331_v9  ;;  %v328_v29 = vld [vmem:[%s257_s22 + $0x18] sm:$0xff] }
  0x70   : > { %v324_v19 = vld [vmem:[%s1037_s8 + $0x28] sm:$0xff]  ;;  %v338_v21 = vand.u32 2147483647, %v332_v10  ;;  %v349_v22 = vmul.f32 0.05, %v343_v11  ;;  %v402_v23 = vadd.f32 %v401_v16, %v329_v12  ;;  %v335_v25 = vsub.f32 %v317_v14, %v323_v18  ;;  %v315_v32 = vld [vmem:[%s1029_s30 + $0x10] sm:$0xff] }
  0x71   : > { %v350_v24 = vmul.f32 0.05, %v344_v15  ;;  %v336_v26 = vsub.f32 %v318_v17, %v324_v19  ;;  %v347_v27 = vand.u32 2147483647, %v323_v18  ;;  %v348_v30 = vand.u32 2147483647, %v324_v19 }
  0x72   : > { %vm355_vm2 = vcmp.le.f32.partialorder %v337_v20, %v349_v22  ;;  %403 = vadd.xlane.f32.xlu1 %v402_v23  ;;  %v397_v31 = vsel %vm370_vm1, %v328_v29, 0.0  ;;  %v316_v33 = vld [vmem:[%s1029_s30 + $0x18] sm:$0xff]  ;;  %v321_v34 = vld [vmem:[%s1037_s8 + $0x10] sm:$0xff]  ;;  %v341_v36 = vand.u32 2147483647, %v335_v25  ;;  %s1120_s10 = smov (!%p297_p9, %s296_s10), 5 }
  0x73   : > { %vm356_vm3 = vcmp.le.f32.partialorder %v338_v21, %v350_v24  ;;  %v361_v35 = vsel %vm355_vm2, %v325_v1, 0.0  ;;  %v342_v37 = vand.u32 2147483647, %v336_v26  ;;  %v322_v38 = vld [vmem:[%s1037_s8 + $0x18] sm:$0xff]  ;;  %v353_v40 = vmul.f32 0.05, %v347_v27 }
  0x74   : > { %v362_v39 = vsel %vm356_vm3, %v326_v2, 0.0  ;;  %v354_v41 = vmul.f32 0.05, %v348_v30  ;;  %v398_v42 = vadd.f32 %v397_v31, %v327_v28  ;;  %v333_v44 = vsub.f32 %v315_v32, %v321_v34  ;;  %v390_v61 = vld [vmem:[#allocation3] sm:$0xff]  ;;  %v392_v63 = vld [vmem:[#allocation3 + $0x10] sm:$0xff]  ;;  %v391_v3 = vld [vmem:[#allocation3 + $0x8] sm:$0xff] }
  0x75   : > { %v371_v43 = vsel %vm370_vm1, %v362_v39, 0.0  ;;  %v334_v45 = vsub.f32 %v316_v33, %v322_v38  ;;  %v345_v46 = vand.u32 2147483647, %v321_v34  ;;  %vm359_vm4 = vcmp.le.f32.partialorder %v341_v36, %v353_v40  ;;  %v367_v5 = vld [vmem:[#allocation2] sm:$0xff]  ;;  %v369_v10 = vld [vmem:[#allocation2 + $0x10] sm:$0xff]  ;;  %v368_v15 = vld [vmem:[#allocation2 + $0x8] sm:$0xff] }
  0x76   : > { %vm360_vm5 = vcmp.le.f32.partialorder %v342_v37, %v354_v41  ;;  %399 = vadd.xlane.f32.xlu0 %v398_v42  ;;  %v372_v47 = vadd.f32 %v371_v43, %v361_v35  ;;  %v346_v48 = vand.u32 2147483647, %v322_v38  ;;  %v365_v49 = vsel %vm359_vm4, %v329_v12, 0.0  ;;  %s580_s15 = sshll.u32 %s1120_s10, 3 }
  0x77   : > { %v366_v50 = vsel %vm360_vm5, %v330_v13, 0.0  ;;  %v339_v51 = vand.u32 2147483647, %v333_v44  ;;  %v340_v52 = vand.u32 2147483647, %v334_v45  ;;  %s300_s24 = scalar_lea.vmem %s1101_s3, %s580_s15 }
  0x78   : > { %373 = vadd.xlane.f32.xlu1 %v372_v47  ;;  %v351_v53 = vmul.f32 0.05, %v345_v46  ;;  %v352_v54 = vmul.f32 0.05, %v346_v48  ;;  %v379_v55 = vsel %vm370_vm1, %v366_v50, 0.0 }
  0x79   : > { %v380_v56 = vadd.f32 %v379_v55, %v365_v49 }
  0x7a   : > { %vm357_vm6 = vcmp.le.f32.partialorder %v339_v51, %v351_v53  ;;  %vm358_vm7 = vcmp.le.f32.partialorder %v340_v52, %v352_v54 }
  0x7b   : > { %v363_v57 = vsel %vm357_vm6, %v327_v28, 0.0  ;;  %v364_v58 = vsel %vm358_vm7, %v328_v29, 0.0 }
  0x7c   : > { %v375_v59 = vsel %vm370_vm1, %v364_v58, 0.0  ;;  %381 = vadd.xlane.f32.xlu1 %v380_v56 }
  0x7d   : > { %v376_v60 = vadd.f32 %v375_v59, %v363_v57 }
  0x7f   : > { %377 = vadd.xlane.f32.xlu0 %v376_v60 }
  0xfc   : > { %v396_v62 = vpop.xlane.xlu0 %395 }
  0xfd   : > { %v405_v0 = vadd.f32 %v396_v62, %v390_v61 }
  0xff   : > { %v404_v1 = vpop.xlane.xlu1 %403  ;;  %408 = vst.msk [vmem:[#allocation3] sm:$0xff] %vm306_vm0, %v405_v0 }
 0x100   : > { %v407_v2 = vadd.f32 %v404_v1, %v392_v63 }
 0x102   : > { %410 = vst.msk [vmem:[#allocation3 + $0x10] sm:$0xff] %vm306_vm0, %v407_v2 }
 0x103   : > { %v400_v4 = vpop.xlane.xlu0 %399 }
 0x104   : > { %v406_v6 = vadd.f32 %v400_v4, %v391_v3 }
 0x105   : > { %v374_v7 = vpop.xlane.xlu1 %373 }
 0x106   : > { %409 = vst.msk [vmem:[#allocation3 + $0x8] sm:$0xff] %vm306_vm0, %v406_v6  ;;  %v383_v8 = vadd.f32 %v374_v7, %v367_v5  ;;  %v417_v9 = vld [vmem:[#allocation3] sm:$0xff] }
 0x107   : > { %v420_v11 = vmax.f32 %v417_v9, 1.0 }
 0x108   : > { %387 = vst.msk [vmem:[#allocation2] sm:$0xff] %vm306_vm0, %v383_v8 }
 0x109   : > { %v419_v12 = vld [vmem:[#allocation3 + $0x10] sm:$0xff]  ;;  %v382_v13 = vpop.xlane.xlu1 %381  ;;  %664 = vrcp.f32 %v420_v11 }
 0x10a   : > { %v422_v14 = vmax.f32 %v419_v12, 1.0  ;;  %v385_v16 = vadd.f32 %v382_v13, %v369_v10 }
 0x10c   : > { %v378_v17 = vpop.xlane.xlu0 %377  ;;  %389 = vst.msk [vmem:[#allocation2 + $0x10] sm:$0xff] %vm306_vm0, %v385_v16  ;;  %666 = vrcp.f32 %v422_v14 }
 0x10d   : > { %v418_v18 = vld [vmem:[#allocation3 + $0x8] sm:$0xff]  ;;  %v384_v19 = vadd.f32 %v378_v17, %v368_v15 }
 0x10e   : > { %v421_v20 = vmax.f32 %v418_v18, 1.0 }
 0x10f   : > { %v414_v21 = vld [vmem:[#allocation2] sm:$0xff]  ;;  %388 = vst.msk [vmem:[#allocation2 + $0x8] sm:$0xff] %vm306_vm0, %v384_v19 }
 0x110   : > { %668 = vrcp.f32 %v421_v20  ;;  %v423_v22 = vmul.f32 2.0, %v414_v21 }
 0x112   : > { %v426_v23 = vsub.f32 %v423_v22, %v417_v9 }
 0x113   : > { %v416_v24 = vld [vmem:[#allocation2 + $0x10] sm:$0xff]  ;;  %v665_v25 = vpop.eup %664 }
 0x114   : > { %v425_v26 = vmul.f32 2.0, %v416_v24  ;;  %v430_v27 = vmul.f32 %v665_v25, %v426_v23 }
 0x116   : > { %v415_v28 = vld [vmem:[#allocation2 + $0x8] sm:$0xff]  ;;  %v428_v29 = vsub.f32 %v425_v26, %v419_v12  ;;  %v667_v30 = vpop.eup %666  ;;  %v435_v31 = vsub.f32 1.0, %v430_v27 }
 0x117   : > { %v424_v32 = vmul.f32 2.0, %v415_v28 }
 0x118   : > { %438 = vst.msk [vmem:[%s300_s24] sm:$0xff] %vm306_vm0, %v435_v31  ;;  %v434_v35 = vmul.f32 %v667_v30, %v428_v29 }
 0x119   : > { %v427_v33 = vsub.f32 %v424_v32, %v418_v18 }
 0x11a   : > { %v669_v34 = vpop.eup %668  ;;  %v437_v38 = vsub.f32 1.0, %v434_v35 }
 0x11b   : > { %v432_v36 = vmul.f32 %v669_v34, %v427_v33 }
 0x11c   : > { %440 = vst.msk [vmem:[%s300_s24 + $0x10] sm:$0xff] %vm306_vm0, %v437_v38 }
 0x11d   : > { %v436_v37 = vsub.f32 1.0, %v432_v36 }
 0x11f   : > { %439 = vst.msk [vmem:[%s300_s24 + $0x8] sm:$0xff] %vm306_vm0, %v436_v37 }
 0x120 PF: > { %s19_s17 = sadd.s32 1, %s814_s17   ;;  %s1112_s12 = smov %s798_s13 }
 0x121   : > { %p16_p2 = scmp.ge.s32.totalorder %s19_s17, 4   ;;  %s1113_s13 = smov %s802_s14 }
 0x122   : > { %s1114_s14 = smov %s889_s23  ;;  %s1115_s15 = smov %s810_s16 }
 0x123   : > { %s1116_s16 = smov %s1118_s19  ;;  %18 = sbr.rel (!%p16_p2) target bundleno = 6 (0x6), region = 104 }
 0x12a   :  { %463 = vsyncpa [#allocation5], 1 }
 0x12b   :  { %465 = vsyncpa [#allocation5 + $0x1], 1 }
 0x12c   :  { %466 = vsyncpa [#allocation7], 1 }
 0x12d   :  { %468 = vsyncpa [#allocation7 + $0x1], 1 }

</bundles_post_ra>
